<compile_context>
chip_gen: v7x
topology: tpu7x:2x2x1
jax: 0.10.0
libtpu: 0.0.40
codegen_flags: <defaults>
</compile_context>

<pallas_src>
import math
from typing import Optional

import jax
import jax.numpy as jnp
from jax.experimental import pallas as pl
from jax.experimental.pallas import tpu as pltpu


def _round_up(x: int, m: int) -> int:
    return ((x + m - 1) // m) * m


def _device_kind() -> str:
    try:
        return jax.devices()[0].device_kind.lower()
    except Exception:
        return ""


def _vmem_capacity_bytes() -> int:
    try:
        return int(pltpu.get_tpu_info().vmem_capacity_bytes)
    except Exception:
        return 64 << 20  # conservative default: v7x per-TensorCore budget


# -----------------------------------------------------------------------------
# Parameter / table construction (deterministic, mirrors nn.Module __init__)
# -----------------------------------------------------------------------------
def make_sinusoidal_table(T: int, d_model: int) -> jnp.ndarray:
    """Reproduces the interleaved [sin, cos] table from the PyTorch module."""
    assert d_model % 2 == 0
    freqs = jnp.arange(0, d_model, 2, dtype=jnp.float32) / d_model * math.log(10000.0)
    freqs = jnp.exp(-freqs)                                 # (d_model//2,)
    pos = jnp.arange(T, dtype=jnp.float32)                  # (T,)
    ang = pos[:, None] * freqs[None, :]                     # (T, d_model//2)
    emb = jnp.stack([jnp.sin(ang), jnp.cos(ang)], axis=-1)  # (T, d_model//2, 2)
    return emb.reshape(T, d_model)                          # interleaved sin/cos


def xavier_uniform(key, fan_in: int, fan_out: int) -> jnp.ndarray:
    """xavier_uniform_ equivalent, returned pre-transposed as (fan_in, fan_out)."""
    bound = math.sqrt(6.0 / (fan_in + fan_out))
    return jax.random.uniform(
        key, (fan_in, fan_out), dtype=jnp.float32, minval=-bound, maxval=bound
    )


def init_time_embedding(key, T: int, d_model: int, dim: int):
    """Raw module parameters (float32, as in the PyTorch module)."""
    k_w1, k_w2 = jax.random.split(key)
    return {
        "table": make_sinusoidal_table(T, d_model),   # frozen embedding
        "w1": xavier_uniform(k_w1, d_model, dim),     # Linear(d_model, dim)
        "b1": jnp.zeros((dim,), jnp.float32),
        "w2": xavier_uniform(k_w2, dim, dim),         # Linear(dim, dim)
        "b2": jnp.zeros((dim,), jnp.float32),
    }


def pack_time_embedding_params(table, w1, b1, w2, b2):
    """Host-side, one-time prepack:
    - fold Embedding ∘ Linear1 into pre = table @ W1 + b1 (exact: table frozen),
    - pad T and dim to hardware-friendly multiples (lane-dense, packing-safe),
    - store weight tables in bf16 for the MXU (padding is zeros -> exact).
    Note: rounding `pre` to bf16 rounds the post-Linear1 / pre-Swish activations
    to bf16 (accepted precision model; ~1e-1 agreement with the f32 module)."""
    T, _ = table.shape
    dim = w1.shape[1]
    T_pad = _round_up(T, 128)
    dim_pad = _round_up(dim, 128)

    pre = table.astype(jnp.float32) @ w1.astype(jnp.float32) + b1   # (T, dim)
    pre_p = (
        jnp.zeros((T_pad, dim_pad), jnp.float32).at[:T, :dim].set(pre)
    ).astype(jnp.bfloat16)
    w2_p = (
        jnp.zeros((dim_pad, dim_pad), jnp.float32).at[:dim, :dim].set(w2)
    ).astype(jnp.bfloat16)
    b2_p = jnp.zeros((1, dim_pad), jnp.float32).at[0, :dim].set(b2)
    return {"pre": pre_p, "w2": w2_p, "b2": b2_p, "T": T, "dim": dim}


# -----------------------------------------------------------------------------
# Kernels
# -----------------------------------------------------------------------------
def _time_emb_onehot_kernel(t_ref, pre_ref, w2_ref, b2_ref, o_ref):
    """Gather pre[t] as a one-hot bf16 matmul on the MXU, then Swish + Linear2."""
    block_b = t_ref.shape[0]
    t_pad = pre_ref.shape[0]

    # One-hot built directly as bool -> bf16 (no f32 intermediate, no select).
    t_idx = t_ref[...]                                                # (bb, 1) i32
    lane = jax.lax.broadcasted_iota(jnp.int32, (block_b, t_pad), 1)   # (bb, T_pad)
    onehot = (lane == t_idx).astype(pre_ref.dtype)                    # (bb, T_pad) bf16
    h = jnp.dot(onehot, pre_ref[...], preferred_element_type=jnp.float32)

    # Swish in f32 (v5e has no bf16 VPU/EUP; keep the activation path f32).
    h = h * jax.nn.sigmoid(h)

    out = jnp.dot(h.astype(w2_ref.dtype), w2_ref[...],
                  preferred_element_type=jnp.float32)
    o_ref[...] = (out + b2_ref[...]).astype(o_ref.dtype)


def _time_emb_gather_kernel(t_sm, pre_ref, w2_ref, b2_ref, o_ref, gbuf):
    """Gather pre[t] with dynamic sublane slices from the VMEM-resident table
    (t lives in SMEM via scalar prefetch).  Keeps the MXU for Linear2 only —
    used for very large timestep tables where the one-hot contraction would
    dominate the MXU."""
    block_b = o_ref.shape[0]
    t_pad = pre_ref.shape[0]
    base = pl.program_id(0) * block_b

    def body(r, carry):
        # Clamp so an out-of-range timestep can never read OOB VMEM.
        idx = jnp.clip(t_sm[base + r], 0, t_pad - 1)
        gbuf[pl.ds(r, 1), :] = pre_ref[pl.ds(idx, 1), :]
        return carry

    jax.lax.fori_loop(0, block_b, body, 0, unroll=False)

    h = gbuf[...].astype(jnp.float32)
    h = h * jax.nn.sigmoid(h)
    out = jnp.dot(h.astype(w2_ref.dtype), w2_ref[...],
                  preferred_element_type=jnp.float32)
    o_ref[...] = (out + b2_ref[...]).astype(o_ref.dtype)


# -----------------------------------------------------------------------------
# Tiling / budget heuristics
# -----------------------------------------------------------------------------
def _choose_block_b(B: int) -> int:
    """Generation-aware batch tile: fill the MXU rows (128 on v2-v5, 256 on
    v6e/v7x), and keep >=2 grid steps at small B so both v7x TensorCores get
    work under dimension_semantics=('parallel',)."""
    kind = _device_kind()
    max_bb = 128 if any(v in kind for v in ("v2", "v3", "v4", "v5")) else 512
    if B >= 4096:
        bb = 512
    elif B >= 512:
        bb = 256
    elif B >= 256:
        bb = 128
    else:
        bb = max(8, _round_up((B + 1) // 2, 8))   # aim for 2 grid steps
    return max(8, min(bb, max_bb, _round_up(B, 8)))


def _vmem_bytes(block_b, T_pad, dim_pad, out_itemsize, use_onehot):
    """Conservative VMEM estimate (resident tables counted double-buffered so
    the estimate stays valid if the single-buffer request is unavailable)."""
    weights = 2 * (T_pad * dim_pad * 2 + dim_pad * dim_pad * 2 + 8 * dim_pad * 4)
    io = 2 * block_b * dim_pad * out_itemsize                 # output tile, 2-buffered
    if use_onehot:
        io += 2 * block_b * 128 * 4                           # t tile (lane-padded i32)
        tmp = block_b * T_pad * 2 + 2 * block_b * dim_pad * 4  # one-hot + f32 activations
    else:
        tmp = block_b * dim_pad * 2 + 2 * block_b * dim_pad * 4  # gather scratch + f32
    return weights + io + tmp


def _build_call(*, use_onehot, block_b, B_pad, T_pad, dim_pad, out_dtype,
                vmem_limit, cost, single_buffer_resident):
    grid = (B_pad // block_b,)

    def _resident(shape):
        idx_map = lambda i, *_: (0,) * len(shape)
        if single_buffer_resident:
            try:
                # Constant index_map => no re-DMA across steps; don't double-buffer.
                return pl.BlockSpec(shape, idx_map, pipeline_mode=pl.Buffered(1))
            except Exception:
                pass
        return pl.BlockSpec(shape, idx_map)

    resident_specs = [
        _resident((T_pad, dim_pad)),      # pre  (bf16, VMEM-resident)
        _resident((dim_pad, dim_pad)),    # W2   (bf16, VMEM-resident)
        _resident((1, dim_pad)),          # b2   (f32)
    ]
    out_spec = pl.BlockSpec((block_b, dim_pad), lambda i, *_: (i, 0))

    if use_onehot:
        grid_spec = pltpu.PrefetchScalarGridSpec(
            num_scalar_prefetch=0,
            grid=grid,
            in_specs=[pl.BlockSpec((block_b, 1), lambda i, *_: (i, 0))] + resident_specs,
            out_specs=out_spec,
        )
        kernel = _time_emb_onehot_kernel
    else:
        grid_spec = pltpu.PrefetchScalarGridSpec(
            num_scalar_prefetch=1,              # t -> SMEM
            grid=grid,
            in_specs=resident_specs,
            out_specs=out_spec,
            scratch_shapes=[pltpu.VMEM((block_b, dim_pad), jnp.bfloat16)],
        )
        kernel = _time_emb_gather_kernel

    return pl.pallas_call(
        kernel,
        out_shape=jax.ShapeDtypeStruct((B_pad, dim_pad), out_dtype),
        grid_spec=grid_spec,
        compiler_params=pltpu.CompilerParams(
            dimension_semantics=("parallel",),
            vmem_limit_bytes=vmem_limit,
        ),
        cost_estimate=cost,
    )


# -----------------------------------------------------------------------------
# Forward wrapper
# -----------------------------------------------------------------------------
def time_embedding_forward(t, packed, *, block_b: Optional[int] = None,
                           out_dtype=jnp.float32, gather: Optional[str] = None,
                           validate_t: bool = False):
    """t: (B,) integer timesteps -> (B, dim) embeddings (dtype = out_dtype).

    gather: None (auto), "onehot" (MXU one-hot gather; best up to T_pad ~ 2048,
            which covers DDPM's T=1000) or "loop" (dynamic-slice gather from the
            VMEM-resident table; for very large timestep tables).
    out_dtype: jnp.float32 (module semantics) or jnp.bfloat16 (halves writeback
            bytes when the consumer is a bf16 network).
    """
    pre, w2, b2 = packed["pre"], packed["w2"], packed["b2"]
    T, dim = packed["T"], packed["dim"]
    T_pad, dim_pad = pre.shape
    B = t.shape[0]

    # torch.nn.Embedding raises on out-of-range t; opt-in host-side check only
    # (forces a device sync, so it is off by default inside training loops).
    # TODO(synk): inside jit / for traced t there is no in-kernel error; invalid
    # indices select a zero row (one-hot path) or are clamped (loop path).
    if validate_t:
        try:
            tv = jax.device_get(t)
        except Exception:
            tv = None  # traced value: skip
        if tv is not None and tv.size:
            tmin, tmax = int(tv.min()), int(tv.max())
            if tmin < 0 or tmax >= T:
                raise ValueError(
                    f"timestep indices must lie in [0, {T}); got [{tmin}, {tmax}]")

    # Gather strategy: one-hot costs ~T_pad/128 MXU cycles per row; a serial row
    # copy costs ~10-30 VLIW cycles per row, so the crossover sits near
    # T_pad ~ 2048 (the kernel is not purely MXU-bound).  The loop path remains
    # available (and forceable) for very large tables.
    if gather is None:
        use_onehot = T_pad <= 2048
    else:
        use_onehot = (gather == "onehot")

    if block_b is None:
        block_b = _choose_block_b(B)
    block_b = max(8, _round_up(block_b, 8))

    out_itemsize = jnp.dtype(out_dtype).itemsize
    budget = int(_vmem_capacity_bytes() * 0.75)   # ~48 MiB on v7x, ~96 MiB on v5e/v6e

    def _est(bb):
        return _vmem_bytes(bb, T_pad, dim_pad, out_itemsize, use_onehot) + (2 << 20)

    # Shrink the batch tile if the conservative estimate would not fit VMEM.
    while block_b > 8 and _est(block_b) > budget:
        block_b = max(8, _round_up(block_b // 2, 8))

    B_pad = _round_up(B, block_b)
    vmem_limit = int(min(max(_est(block_b), 16 << 20), budget))

    # Cost hint so XLA can schedule/overlap this small custom call.
    try:
        gather_flops = 2 * B_pad * T_pad * dim_pad if use_onehot else 0
        cost = pl.CostEstimate(
            flops=int(gather_flops + 2 * B_pad * dim_pad * dim_pad),
            transcendentals=int(B_pad * dim_pad),
            bytes_accessed=int(B_pad * 4 + B_pad * dim_pad * out_itemsize
                               + T_pad * dim_pad * 2 + dim_pad * dim_pad * 2
                               + dim_pad * 4),
        )
    except Exception:
        cost = None

    # Only pad the batch when needed (padded rows use index 0, a valid row, and
    # their outputs are sliced off below).
    t_i32 = t.astype(jnp.int32)
    if B_pad != B:
        t_i32 = jnp.pad(t_i32, (0, B_pad - B))
    t_arg = t_i32[:, None] if use_onehot else t_i32

    def run(single_buffer_resident):
        call = _build_call(use_onehot=use_onehot, block_b=block_b, B_pad=B_pad,
                           T_pad=T_pad, dim_pad=dim_pad, out_dtype=out_dtype,
                           vmem_limit=vmem_limit, cost=cost,
                           single_buffer_resident=single_buffer_resident)
        return call(t_arg, pre, w2, b2)

    try:
        out = run(True)       # resident tables single-buffered (pl.Buffered(1))
    except Exception:
        out = run(False)      # fall back to default buffering if unsupported

    # Avoid extra HBM copies: only slice when padding actually happened.
    # (Callers that can consume the (B_pad, dim_pad) slab should skip this.)
    if dim_pad != dim:
        out = out[:B, :dim]
    elif B_pad != B:
        out = out[:B]
    return out


# -----------------------------------------------------------------------------
# References for sanity checks
# -----------------------------------------------------------------------------
def time_embedding_ref_f32(t, table, w1, b1, w2, b2):
    """Pure f32 reference (matches the PyTorch module numerics)."""
    emb = jnp.take(table, t, axis=0)
    h = emb @ w1 + b1
    h = h * jax.nn.sigmoid(h)
    return h @ w2 + b2


def time_embedding_ref_matched(t, table, w1, b1, w2, b2):
    """Reference with the same precision choices as the kernel
    (bf16 tables, f32 Swish/accumulation) -> tight tolerance check."""
    pre = (table @ w1 + b1).astype(jnp.bfloat16)
    h = jnp.take(pre, t, axis=0).astype(jnp.float32)
    h = h * jax.nn.sigmoid(h)
    return jnp.dot(h.astype(jnp.bfloat16), w2.astype(jnp.bfloat16),
                   preferred_element_type=jnp.float32) + b2


if __name__ == "__main__":
    key = jax.random.PRNGKey(0)
    k_t, k_p, k_t2, k_p2 = jax.random.split(key, 4)

    # --- Config A: small shapes consistent with the module (one-hot path) ----
    T, d_model, dim, B = 16, 32, 32, 8
    params = init_time_embedding(k_p, T, d_model, dim)
    packed = pack_time_embedding_params(**params)          # one-time host prepack
    t = jax.random.randint(k_t, (B,), 0, T, dtype=jnp.int32)

    out = time_embedding_forward(t, packed, validate_t=True)
    out = jax.block_until_ready(out)
    assert out.shape == (B, dim) and out.dtype == jnp.float32

    ref_m = time_embedding_ref_matched(t, **params)
    assert jnp.allclose(out, ref_m, atol=1e-3, rtol=1e-3), (
        f"max abs err (matched precision) = {float(jnp.max(jnp.abs(out - ref_m)))}")
    ref_f = time_embedding_ref_f32(t, **params)
    assert jnp.allclose(out, ref_f, atol=1e-1, rtol=1e-1), (
        f"max abs err (vs f32 module) = {float(jnp.max(jnp.abs(out - ref_f)))}")

    # bf16 output variant (halves writeback bytes for bf16 consumers).
    out_bf = time_embedding_forward(t, packed, out_dtype=jnp.bfloat16)
    out_bf = jax.block_until_ready(out_bf)
    assert out_bf.shape == (B, dim) and out_bf.dtype == jnp.bfloat16
    assert jnp.allclose(out_bf.astype(jnp.float32), ref_m, atol=5e-2, rtol=5e-2)

    # --- Config B: loop-gather path, lane-dense dim, ragged batch ------------
    T2, d_model2, dim2, B2 = 300, 32, 128, 24
    params2 = init_time_embedding(k_p2, T2, d_model2, dim2)
    packed2 = pack_time_embedding_params(**params2)
    t2 = jax.random.randint(k_t2, (B2,), 0, T2, dtype=jnp.int32)

    out2 = time_embedding_forward(t2, packed2, gather="loop", validate_t=True)
    out2 = jax.block_until_ready(out2)
    assert out2.shape == (B2, dim2)
    ref2 = time_embedding_ref_matched(t2, **params2)
    assert jnp.allclose(out2, ref2, atol=1e-3, rtol=1e-3), (
        f"max abs err (loop gather) = {float(jnp.max(jnp.abs(out2 - ref2)))}")

    # The two gather strategies must agree on the same inputs.
    out2_oh = jax.block_until_ready(
        time_embedding_forward(t2, packed2, gather="onehot"))
    assert jnp.allclose(out2, out2_oh, atol=1e-5, rtol=1e-5)

    print("KERNEL_OK")
</pallas_src>

<mosaic_0001>
module attributes {stable_mosaic.version = 11 : i64} {
  func.func @_time_emb_onehot_kernel(%arg0: i32, %arg1: memref<8x1xi32, #tpu.memory_space<vmem>>, %arg2: memref<128x128xbf16, #tpu.memory_space<vmem>>, %arg3: memref<128x128xbf16, #tpu.memory_space<vmem>>, %arg4: memref<1x128xf32, #tpu.memory_space<vmem>>, %arg5: memref<8x128xf32, #tpu.memory_space<vmem>>) attributes {dimension_semantics = [#tpu.dimension_semantics<parallel>], iteration_bounds = array<i64: 1>, scalar_prefetch = 0 : i64, scratch_operands = 0 : i64, tpu.core_type = #tpu.core_type<tc>, window_params = [{transform_indices = @transform_0, window_bounds = array<i64: 8, 1>}, {pipeline_mode = #tpu.pipeline_mode<synchronous>, transform_indices = @transform_1, window_bounds = array<i64: 128, 128>}, {pipeline_mode = #tpu.pipeline_mode<synchronous>, transform_indices = @transform_2, window_bounds = array<i64: 128, 128>}, {pipeline_mode = #tpu.pipeline_mode<synchronous>, transform_indices = @transform_3, window_bounds = array<i64: 1, 128>}, {transform_indices = @transform_4, window_bounds = array<i64: 8, 128>}]} {
    %c0 = arith.constant 0 : index
    %c0_0 = arith.constant 0 : index
    %0 = vector.load %arg1[%c0, %c0_0] : memref<8x1xi32, #tpu.memory_space<vmem>>, vector<8x1xi32>
    %1 = tpu.iota {dimensions = array<i32: 1>} : vector<8x128xi32>
    %2 = vector.broadcast %0 : vector<8x1xi32> to vector<8x128xi32>
    %3 = arith.cmpi eq, %1, %2 : vector<8x128xi32>
    %4 = arith.extui %3 : vector<8x128xi1> to vector<8x128xi32>
    %5 = arith.sitofp %4 : vector<8x128xi32> to vector<8x128xf32>
    %6 = arith.truncf %5 : vector<8x128xf32> to vector<8x128xbf16>
    %c0_1 = arith.constant 0 : index
    %c0_2 = arith.constant 0 : index
    %7 = vector.load %arg2[%c0_1, %c0_2] : memref<128x128xbf16, #tpu.memory_space<vmem>>, vector<128x128xbf16>
    %cst = arith.constant dense<0.000000e+00> : vector<8x128xf32>
    %8 = tpu.matmul %6, %7, %cst {dimension_numbers = #tpu.dot_dimension_numbers<[1], [0], [0], [1], [0, 0, 1, 1], [], []>} : vector<8x128xbf16>, vector<128x128xbf16>, vector<8x128xf32> -> vector<8x128xf32>
    %9 = arith.negf %8 : vector<8x128xf32>
    %10 = math.exp %9 : vector<8x128xf32>
    %cst_3 = arith.constant 1.000000e+00 : f32
    %11 = vector.broadcast %cst_3 : f32 to vector<8x128xf32>
    %12 = arith.addf %11, %10 : vector<8x128xf32>
    %13 = arith.divf %11, %12 : vector<8x128xf32>
    %14 = arith.mulf %8, %13 : vector<8x128xf32>
    %15 = arith.truncf %14 : vector<8x128xf32> to vector<8x128xbf16>
    %c0_4 = arith.constant 0 : index
    %c0_5 = arith.constant 0 : index
    %16 = vector.load %arg3[%c0_4, %c0_5] : memref<128x128xbf16, #tpu.memory_space<vmem>>, vector<128x128xbf16>
    %cst_6 = arith.constant dense<0.000000e+00> : vector<8x128xf32>
    %17 = tpu.matmul %15, %16, %cst_6 {dimension_numbers = #tpu.dot_dimension_numbers<[1], [0], [0], [1], [0, 0, 1, 1], [], []>} : vector<8x128xbf16>, vector<128x128xbf16>, vector<8x128xf32> -> vector<8x128xf32>
    %c0_7 = arith.constant 0 : index
    %c0_8 = arith.constant 0 : index
    %18 = vector.load %arg4[%c0_7, %c0_8] : memref<1x128xf32, #tpu.memory_space<vmem>>, vector<1x128xf32>
    %19 = vector.broadcast %18 : vector<1x128xf32> to vector<8x128xf32>
    %20 = arith.addf %17, %19 : vector<8x128xf32>
    %c0_9 = arith.constant 0 : index
    %c0_10 = arith.constant 0 : index
    %21 = vector.load %arg5[%c0_9, %c0_10] : memref<8x128xf32, #tpu.memory_space<vmem>>, vector<8x128xf32>
    tpu.vector_store %arg5[%c0_9, %c0_10], %20 {strides = array<i32>} : memref<8x128xf32, #tpu.memory_space<vmem>>, vector<8x128xf32>,
    return
  }
  func.func @transform_0(%arg0: i32) -> (i32, i32) {
    %c0_i32 = arith.constant 0 : i32
    %c0_i32_0 = arith.constant 0 : i32
    return %arg0, %c0_i32 : i32, i32
  }
  func.func @transform_1(%arg0: i32) -> (i32, i32) {
    %c0_i32 = arith.constant 0 : i32
    %c0_i32_0 = arith.constant 0 : i32
    %c0_i32_1 = arith.constant 0 : i32
    return %c0_i32, %c0_i32_0 : i32, i32
  }
  func.func @transform_2(%arg0: i32) -> (i32, i32) {
    %c0_i32 = arith.constant 0 : i32
    %c0_i32_0 = arith.constant 0 : i32
    %c0_i32_1 = arith.constant 0 : i32
    return %c0_i32, %c0_i32_0 : i32, i32
  }
  func.func @transform_3(%arg0: i32) -> (i32, i32) {
    %c0_i32 = arith.constant 0 : i32
    %c0_i32_0 = arith.constant 0 : i32
    %c0_i32_1 = arith.constant 0 : i32
    return %c0_i32, %c0_i32_0 : i32, i32
  }
  func.func @transform_4(%arg0: i32) -> (i32, i32) {
    %c0_i32 = arith.constant 0 : i32
    %c0_i32_0 = arith.constant 0 : i32
    return %arg0, %c0_i32 : i32, i32
  }
}

module attributes {stable_mosaic.version = 11 : i64} {
  func.func @_time_emb_onehot_kernel(%arg0: i32, %arg1: memref<8x1xi32, #tpu.memory_space<vmem>>, %arg2: memref<128x128xbf16, #tpu.memory_space<vmem>>, %arg3: memref<128x128xbf16, #tpu.memory_space<vmem>>, %arg4: memref<1x128xf32, #tpu.memory_space<vmem>>, %arg5: memref<8x128xf32, #tpu.memory_space<vmem>>) attributes {dimension_semantics = [#tpu.dimension_semantics<parallel>], iteration_bounds = array<i64: 1>, scalar_prefetch = 0 : i64, scratch_operands = 0 : i64, tpu.core_type = #tpu.core_type<tc>, window_params = [{transform_indices = @transform_0, window_bounds = array<i64: 8, 1>}, {pipeline_mode = #tpu.pipeline_mode<synchronous>, transform_indices = @transform_1, window_bounds = array<i64: 128, 128>}, {pipeline_mode = #tpu.pipeline_mode<synchronous>, transform_indices = @transform_2, window_bounds = array<i64: 128, 128>}, {pipeline_mode = #tpu.pipeline_mode<synchronous>, transform_indices = @transform_3, window_bounds = array<i64: 1, 128>}, {transform_indices = @transform_4, window_bounds = array<i64: 8, 128>}]} {
    %c0 = arith.constant 0 : index
    %c0_0 = arith.constant 0 : index
    %0 = vector.load %arg1[%c0, %c0_0] : memref<8x1xi32, #tpu.memory_space<vmem>>, vector<8x1xi32>
    %1 = tpu.iota {dimensions = array<i32: 1>} : vector<8x128xi32>
    %2 = vector.broadcast %0 : vector<8x1xi32> to vector<8x128xi32>
    %3 = arith.cmpi eq, %1, %2 : vector<8x128xi32>
    %4 = arith.extui %3 : vector<8x128xi1> to vector<8x128xi32>
    %5 = arith.sitofp %4 : vector<8x128xi32> to vector<8x128xf32>
    %6 = arith.truncf %5 : vector<8x128xf32> to vector<8x128xbf16>
    %c0_1 = arith.constant 0 : index
    %c0_2 = arith.constant 0 : index
    %7 = vector.load %arg2[%c0_1, %c0_2] : memref<128x128xbf16, #tpu.memory_space<vmem>>, vector<128x128xbf16>
    %cst = arith.constant dense<0.000000e+00> : vector<8x128xf32>
    %8 = tpu.matmul %6, %7, %cst {dimension_numbers = #tpu.dot_dimension_numbers<[1], [0], [0], [1], [0, 0, 1, 1], [], []>} : vector<8x128xbf16>, vector<128x128xbf16>, vector<8x128xf32> -> vector<8x128xf32>
    %9 = arith.negf %8 : vector<8x128xf32>
    %10 = math.exp %9 : vector<8x128xf32>
    %cst_3 = arith.constant 1.000000e+00 : f32
    %11 = vector.broadcast %cst_3 : f32 to vector<8x128xf32>
    %12 = arith.addf %11, %10 : vector<8x128xf32>
    %13 = arith.divf %11, %12 : vector<8x128xf32>
    %14 = arith.mulf %8, %13 : vector<8x128xf32>
    %15 = arith.truncf %14 : vector<8x128xf32> to vector<8x128xbf16>
    %c0_4 = arith.constant 0 : index
    %c0_5 = arith.constant 0 : index
    %16 = vector.load %arg3[%c0_4, %c0_5] : memref<128x128xbf16, #tpu.memory_space<vmem>>, vector<128x128xbf16>
    %cst_6 = arith.constant dense<0.000000e+00> : vector<8x128xf32>
    %17 = tpu.matmul %15, %16, %cst_6 {dimension_numbers = #tpu.dot_dimension_numbers<[1], [0], [0], [1], [0, 0, 1, 1], [], []>} : vector<8x128xbf16>, vector<128x128xbf16>, vector<8x128xf32> -> vector<8x128xf32>
    %c0_7 = arith.constant 0 : index
    %c0_8 = arith.constant 0 : index
    %18 = vector.load %arg4[%c0_7, %c0_8] : memref<1x128xf32, #tpu.memory_space<vmem>>, vector<1x128xf32>
    %19 = vector.broadcast %18 : vector<1x128xf32> to vector<8x128xf32>
    %20 = arith.addf %17, %19 : vector<8x128xf32>
    %c0_9 = arith.constant 0 : index
    %c0_10 = arith.constant 0 : index
    %21 = vector.load %arg5[%c0_9, %c0_10] : memref<8x128xf32, #tpu.memory_space<vmem>>, vector<8x128xf32>
    tpu.vector_store %arg5[%c0_9, %c0_10], %20 {strides = array<i32>} : memref<8x128xf32, #tpu.memory_space<vmem>>, vector<8x128xf32>,
    return
  }
  func.func @transform_0(%arg0: i32) -> (i32, i32) {
    %c0_i32 = arith.constant 0 : i32
    %c0_i32_0 = arith.constant 0 : i32
    return %arg0, %c0_i32 : i32, i32
  }
  func.func @transform_1(%arg0: i32) -> (i32, i32) {
    %c0_i32 = arith.constant 0 : i32
    %c0_i32_0 = arith.constant 0 : i32
    %c0_i32_1 = arith.constant 0 : i32
    return %c0_i32, %c0_i32_0 : i32, i32
  }
  func.func @transform_2(%arg0: i32) -> (i32, i32) {
    %c0_i32 = arith.constant 0 : i32
    %c0_i32_0 = arith.constant 0 : i32
    %c0_i32_1 = arith.constant 0 : i32
    return %c0_i32, %c0_i32_0 : i32, i32
  }
  func.func @transform_3(%arg0: i32) -> (i32, i32) {
    %c0_i32 = arith.constant 0 : i32
    %c0_i32_0 = arith.constant 0 : i32
    %c0_i32_1 = arith.constant 0 : i32
    return %c0_i32, %c0_i32_0 : i32, i32
  }
  func.func @transform_4(%arg0: i32) -> (i32, i32) {
    %c0_i32 = arith.constant 0 : i32
    %c0_i32_0 = arith.constant 0 : i32
    return %arg0, %c0_i32 : i32, i32
  }
}

</mosaic_0001>

<bundles_post_ra>
// kernel: tpu_custom_call.1
= control target key start
LH: loop header
LB: loop body
LE: loop exit
PB: predicated region body
PF: predicated region fallthrough
CT: control target
= control target key end

     0   :  { %9 = vsyncpa [#allocation3], 0  ;;  %s554_s0 = inlined_call_operand.vmem [shape: s32[8,1], index: 0, kind: input, shape index: {}]   ;;  %s555_s1 = inlined_call_operand.hbm [shape: bf16[128,128], index: 1, kind: input, shape index: {}]   ;;  %s556_s2 = inlined_call_operand.hbm [shape: bf16[128,128], index: 2, kind: input, shape index: {}]   ;;  %s557_s3 = inlined_call_operand.vmem [shape: f32[1,128], index: 3, kind: input, shape index: {}]   ;;  %s558_s4 = inlined_call_operand.hbm [shape: f32[8,128], index: 4, kind: output, shape index: {}]  }
   0x1   :  { %10 = vsyncpa [#allocation6], 0 }
   0x2   :  { %11 = vsyncpa [#allocation4], 0  ;;  %s478_s15 = smov [#allocation2]   ;;  %s406_s19 = scalar_lea.hbm %s555_s1, 1024 }
   0x3   :  { %s19_s16 = sshll.u32 %s478_s15, 4  ;;  %p407_p0 = scmp.ne.s32.totalorder %s555_s1, %s406_s19  ;;  %s20_s16 = int_to_ptr.vmem [resolvable:$true] %s19_s16 }
   0x4   :  { %p410_p1 = scmp.lt.u32.totalorder %s406_s19, %s555_s1 }
   0x6   :  { %p412_p2 = pnand %p410_p1, %p407_p0 }
   0x8   :  { %415 = shalt.err (!%p412_p2)
}
   0x9   :  { %s416_s24 = scalar_lea.vmem %s20_s16, 1024  ;;  %p421_p4 = scmp.lt.s32.totalorder %s20_s16, %s20_s16 }
   0xa   :  { %p417_p3 = scmp.ne.s32.totalorder %s20_s16, %s416_s24  ;;  %p422_p5 = scmp.lt.s32.totalorder %s416_s24, %s416_s24 }
   0xc   :  { %p423_p6 = por %p422_p5, %p421_p4 }
   0xe   :  { %p424_p7 = pnand %p423_p6, %p417_p3 }
  0x10   :  { %427 = shalt.err (!%p424_p7)
}
  0x11   :  { %s479_s25 = smov 64   ;;  %s480_s26 = smov 4  }
  0x12   :  { %25 = dma.hbm_to_vmem [thread:$0]  %s555_s1, 1024, %s20_s16, [#allocation3], %s479_s25, %s479_s25, %s480_s26  }
  0x13   :  { %s481_s29 = smov [#allocation5]   ;;  %s428_s7 = scalar_lea.hbm %s556_s2, 1024 }
  0x14   :  { %s31_s30 = sshll.u32 %s481_s29, 4  ;;  %p429_p8 = scmp.ne.s32.totalorder %s556_s2, %s428_s7  ;;  %s32_s30 = int_to_ptr.vmem [resolvable:$true] %s31_s30 }
  0x15   :  { %p432_p9 = scmp.lt.u32.totalorder %s428_s7, %s556_s2 }
  0x17   :  { %p434_p10 = pnand %p432_p9, %p429_p8 }
  0x19   :  { %437 = shalt.err (!%p434_p10)
}
  0x1a   :  { %s438_s12 = scalar_lea.vmem %s32_s30, 1024  ;;  %p443_p12 = scmp.lt.s32.totalorder %s32_s30, %s32_s30 }
  0x1b   :  { %p439_p11 = scmp.ne.s32.totalorder %s32_s30, %s438_s12  ;;  %p444_p13 = scmp.lt.s32.totalorder %s438_s12, %s438_s12 }
  0x1d   :  { %p445_p0 = por %p444_p13, %p443_p12 }
  0x1f   :  { %p446_p1 = pnand %p445_p0, %p439_p11 }
  0x21   :  { %449 = shalt.err (!%p446_p1)
}
  0x22   :  { %37 = dma.hbm_to_vmem [thread:$0]  %s556_s2, 1024, %s32_s30, [#allocation6], %s479_s25, %s479_s25, %s480_s26  }
  0x23   :  { %472 = dma.done.wait [#allocation3], 1024  }
  0x24   :  { %473 = vsyncadd [#allocation3], 4294966272 }
  0x25   :  { %474 = dma.done.wait [#allocation6], 1024  }
  0x26   :  { %475 = vsyncadd [#allocation6], 4294966272  ;;  %v482_v0 = vmov 0   ;;  %v483_v1 = vmov 0.0   ;;  %v47_v2 = vld [vmem:[%s554_s0] sm:$0xff]  ;;  %v386_v3 = vld [vmem:[#allocation2] sm:$0xff]   ;;  %v48_v11 = vlaneseq }
  0x27   :  { %385 = vset.pattern.permute.xlu0 %v482_v0  ;;  %336 = vmatprep.subr.bf16.mxu0 %v483_v1  ;;  %vm484_vm0 = vmmov 0   ;;  %v387_v4 = vld [vmem:[#allocation2 + $0x8] sm:$0xff]   ;;  %v388_v5 = vld [vmem:[#allocation2 + $0x10] sm:$0xff]   ;;  %v389_v6 = vld [vmem:[#allocation2 + $0x18] sm:$0xff]   ;;  %v485_v14 = vmov 1.0|1.0  }
  0x28   :  { %356 = vmatprep.subr.bf16.mxu1 %v483_v1  ;;  %51 = vperm.xlu0 %385, %v47_v2   ;;  %v390_v7 = vld [vmem:[#allocation2 + $0x20] sm:$0xff]   ;;  %v391_v8 = vld [vmem:[#allocation2 + $0x28] sm:$0xff]   ;;  %v392_v9 = vld [vmem:[#allocation2 + $0x30] sm:$0xff]   ;;  %v49_v12 = vand.u32 127, %v48_v11  ;;  %s486_s16 = smov [#allocation7]  }
  0x29   :  { %352 = vmatprep.mubr.msk.bf16.mxu0 %vm484_vm0, %v483_v1  ;;  %372 = vmatprep.mubr.msk.bf16.mxu1 %vm484_vm0, %v483_v1  ;;  %v393_v10 = vld [vmem:[#allocation2 + $0x38] sm:$0xff]   ;;  %v394_v15 = vld [vmem:[#allocation5] sm:$0xff]   ;;  %v395_v16 = vld [vmem:[#allocation5 + $0x8] sm:$0xff]   ;;  %s287_s17 = sshll.u32 %s486_s16, 4  ;;  %s288_s17 = int_to_ptr.vmem [resolvable:$true] %s287_s17 }
  0x2a   :  { %337 = vmatpush3.bf16.msra.mxu0 %v386_v3  ;;  %357 = vmatpush3.bf16.msra.mxu1 %v394_v15  ;;  %v396_v17 = vld [vmem:[#allocation5 + $0x10] sm:$0xff]   ;;  %v397_v18 = vld [vmem:[#allocation5 + $0x18] sm:$0xff]   ;;  %v398_v19 = vld [vmem:[#allocation5 + $0x20] sm:$0xff]   ;;  %s450_s18 = scalar_lea.vmem %s288_s17, 128  ;;  %p455_p3 = scmp.lt.s32.totalorder %s288_s17, %s288_s17 }
  0x2b   :  { %338 = vmatprep.subr.bf16.mxu0 %v483_v1  ;;  %358 = vmatprep.subr.bf16.mxu1 %v483_v1  ;;  %v399_v20 = vld [vmem:[#allocation5 + $0x28] sm:$0xff]   ;;  %v400_v21 = vld [vmem:[#allocation5 + $0x30] sm:$0xff]   ;;  %v401_v22 = vld [vmem:[#allocation5 + $0x38] sm:$0xff]   ;;  %p451_p2 = scmp.ne.s32.totalorder %s288_s17, %s450_s18  ;;  %p456_p4 = scmp.lt.s32.totalorder %s450_s18, %s450_s18 }
  0x2c   :  { %v309_v33 = vld [vmem:[%s557_s3] ss:$0 sm:$0xff] }
  0x2d   :  { %p457_p5 = por %p456_p4, %p455_p3 }
  0x2e   :  { %339 = vmatpush3.bf16.msra.mxu0 %v387_v4  ;;  %359 = vmatpush3.bf16.msra.mxu1 %v395_v16 }
  0x2f   :  { %340 = vmatprep.subr.bf16.mxu0 %v483_v1  ;;  %360 = vmatprep.subr.bf16.mxu1 %v483_v1  ;;  %p458_p6 = pnand %p457_p5, %p451_p2 }
  0x32   :  { %341 = vmatpush3.bf16.msra.mxu0 %v388_v5  ;;  %361 = vmatpush3.bf16.msra.mxu1 %v396_v17 }
  0x33   :  { %342 = vmatprep.subr.bf16.mxu0 %v483_v1  ;;  %362 = vmatprep.subr.bf16.mxu1 %v483_v1 }
  0x36   :  { %343 = vmatpush3.bf16.msra.mxu0 %v389_v6  ;;  %363 = vmatpush3.bf16.msra.mxu1 %v397_v18 }
  0x37   :  { %344 = vmatprep.subr.bf16.mxu0 %v483_v1  ;;  %364 = vmatprep.subr.bf16.mxu1 %v483_v1 }
  0x3a   :  { %345 = vmatpush3.bf16.msra.mxu0 %v390_v7  ;;  %365 = vmatpush3.bf16.msra.mxu1 %v398_v19 }
  0x3b   :  { %346 = vmatprep.subr.bf16.mxu0 %v483_v1  ;;  %366 = vmatprep.subr.bf16.mxu1 %v483_v1 }
  0x3e   :  { %347 = vmatpush3.bf16.msra.mxu0 %v391_v8  ;;  %367 = vmatpush3.bf16.msra.mxu1 %v399_v20 }
  0x3f   :  { %348 = vmatprep.subr.bf16.mxu0 %v483_v1  ;;  %368 = vmatprep.subr.bf16.mxu1 %v483_v1 }
  0x42   :  { %349 = vmatpush3.bf16.msra.mxu0 %v392_v9  ;;  %369 = vmatpush3.bf16.msra.mxu1 %v400_v21 }
  0x43   :  { %350 = vmatprep.subr.bf16.mxu0 %v483_v1  ;;  %370 = vmatprep.subr.bf16.mxu1 %v483_v1 }
  0x46   :  { %351 = vmatpush3.bf16.msra.mxu0 %v393_v10  ;;  %371 = vmatpush3.bf16.msra.mxu1 %v401_v22 }
  0xa7   :  { %v52_v13 = vpop.permute.xlu0 %51 }
  0xa8   :  { %vm53_vm1 = vcmp.eq.s32.totalorder %v49_v12, %v52_v13 }
  0xa9   :  { %vm306_vm2 = vmpackc.low %vm53_vm1, %vm53_vm1 }
  0xaa   :  { %353 = vmatmul.mubr.msk.bf16.vlgmr.msra.gmra.mrb[0].mxu0 %vm306_vm2, %v485_v14 }
 0x17d   :  { %v155_v23 = vpop.f32.mrb[0].mxu0 }
 0x17e   :  { %v308_v24 = vmul.f32 -1.442695, %v155_v23  ;;  %v354_v25 = vpop.f32.mrb[1].mxu0 }
 0x17f   :  { %v158_v26 = vpop.f32.mrb[2].mxu0 }
 0x180   :  { %402 = vpow2.f32 %v308_v24  ;;  %v355_v27 = vpop.f32.mrb[3].mxu0 }
 0x18a   :  { %v403_v28 = vpop.eup %402 }
 0x18b   :  { %v164_v29 = vadd.f32 1.0, %v403_v28 }
 0x18d   :  { %404 = vrcp.f32 %v164_v29 }
 0x197   :  { %v405_v30 = vpop.eup %404 }
 0x198   :  { %v167_v31 = vmul.f32 %v405_v30, %v155_v23 }
 0x19a   :  { %v168_v32 = vpack.c.bf16 %v167_v31, %v167_v31 }
 0x19c   :  { %373 = vmatmul.mubr.bf16.vlgmr.msra.gmra.mrb[0].mxu1 %v168_v32 }
 0x26f   :  { %v274_v34 = vpop.f32.mrb[0].mxu1 }
 0x270   :  { %v275_v35 = vadd.f32 %v309_v33, %v274_v34  ;;  %v374_v36 = vpop.f32.mrb[1].mxu1 }
 0x271   :  { %v277_v37 = vpop.f32.mrb[2].mxu1 }
 0x272   :  { %280 = vst [vmem:[#allocation7] sm:$0xff] %v275_v35  ;;  %v375_v38 = vpop.f32.mrb[3].mxu1 }
 0x273   :  { %461 = shalt.err (!%p458_p6)
}
 0x274   :  { %s462_s3 = scalar_lea.hbm %s558_s4, 128 }
 0x275   :  { %p463_p7 = scmp.ne.s32.totalorder %s558_s4, %s462_s3  ;;  %p466_p8 = scmp.lt.u32.totalorder %s462_s3, %s558_s4 }
 0x277   :  { %p468_p9 = pnand %p466_p8, %p463_p7 }
 0x279   :  { %471 = shalt.err (!%p468_p9)
}
 0x27a   :  { %290 = dma.vmem_to_hbm [thread:$0]  %s288_s17, 128, %s558_s4, [#allocation4]  }
 0x27b   :  { %476 = dma.done.wait [#allocation4], 128  }
 0x27c   :  { %477 = vsyncadd [#allocation4], 4294967168 }
 0x27d   :  { %294 = vsyncpa [#allocation3], 1 }
 0x27e   :  { %295 = vsyncpa [#allocation6], 1 }
 0x27f   :  { %296 = vsyncpa [#allocation4], 1 }

// kernel: tpu_custom_call.1
= control target key start
LH: loop header
LB: loop body
LE: loop exit
PB: predicated region body
PF: predicated region fallthrough
CT: control target
= control target key end

     0   :  { %9 = vsyncpa [#allocation3], 0  ;;  %s554_s0 = inlined_call_operand.vmem [shape: s32[8,1], index: 0, kind: input, shape index: {}]   ;;  %s555_s1 = inlined_call_operand.hbm [shape: bf16[128,128], index: 1, kind: input, shape index: {}]   ;;  %s556_s2 = inlined_call_operand.hbm [shape: bf16[128,128], index: 2, kind: input, shape index: {}]   ;;  %s557_s3 = inlined_call_operand.vmem [shape: f32[1,128], index: 3, kind: input, shape index: {}]   ;;  %s558_s4 = inlined_call_operand.hbm [shape: f32[8,128], index: 4, kind: output, shape index: {}]  }
   0x1   :  { %10 = vsyncpa [#allocation6], 0 }
   0x2   :  { %11 = vsyncpa [#allocation4], 0  ;;  %s478_s15 = smov [#allocation2]   ;;  %s406_s19 = scalar_lea.hbm %s555_s1, 1024 }
   0x3   :  { %s19_s16 = sshll.u32 %s478_s15, 4  ;;  %p407_p0 = scmp.ne.s32.totalorder %s555_s1, %s406_s19  ;;  %s20_s16 = int_to_ptr.vmem [resolvable:$true] %s19_s16 }
   0x4   :  { %p410_p1 = scmp.lt.u32.totalorder %s406_s19, %s555_s1 }
   0x6   :  { %p412_p2 = pnand %p410_p1, %p407_p0 }
   0x8   :  { %415 = shalt.err (!%p412_p2)
}
   0x9   :  { %s416_s24 = scalar_lea.vmem %s20_s16, 1024  ;;  %p421_p4 = scmp.lt.s32.totalorder %s20_s16, %s20_s16 }
   0xa   :  { %p417_p3 = scmp.ne.s32.totalorder %s20_s16, %s416_s24  ;;  %p422_p5 = scmp.lt.s32.totalorder %s416_s24, %s416_s24 }
   0xc   :  { %p423_p6 = por %p422_p5, %p421_p4 }
   0xe   :  { %p424_p7 = pnand %p423_p6, %p417_p3 }
  0x10   :  { %427 = shalt.err (!%p424_p7)
}
  0x11   :  { %s479_s25 = smov 64   ;;  %s480_s26 = smov 4  }
  0x12   :  { %25 = dma.hbm_to_vmem [thread:$0]  %s555_s1, 1024, %s20_s16, [#allocation3], %s479_s25, %s479_s25, %s480_s26  }
  0x13   :  { %s481_s29 = smov [#allocation5]   ;;  %s428_s7 = scalar_lea.hbm %s556_s2, 1024 }
  0x14   :  { %s31_s30 = sshll.u32 %s481_s29, 4  ;;  %p429_p8 = scmp.ne.s32.totalorder %s556_s2, %s428_s7  ;;  %s32_s30 = int_to_ptr.vmem [resolvable:$true] %s31_s30 }
  0x15   :  { %p432_p9 = scmp.lt.u32.totalorder %s428_s7, %s556_s2 }
  0x17   :  { %p434_p10 = pnand %p432_p9, %p429_p8 }
  0x19   :  { %437 = shalt.err (!%p434_p10)
}
  0x1a   :  { %s438_s12 = scalar_lea.vmem %s32_s30, 1024  ;;  %p443_p12 = scmp.lt.s32.totalorder %s32_s30, %s32_s30 }
  0x1b   :  { %p439_p11 = scmp.ne.s32.totalorder %s32_s30, %s438_s12  ;;  %p444_p13 = scmp.lt.s32.totalorder %s438_s12, %s438_s12 }
  0x1d   :  { %p445_p0 = por %p444_p13, %p443_p12 }
  0x1f   :  { %p446_p1 = pnand %p445_p0, %p439_p11 }
  0x21   :  { %449 = shalt.err (!%p446_p1)
}
  0x22   :  { %37 = dma.hbm_to_vmem [thread:$0]  %s556_s2, 1024, %s32_s30, [#allocation6], %s479_s25, %s479_s25, %s480_s26  }
  0x23   :  { %472 = dma.done.wait [#allocation3], 1024  }
  0x24   :  { %473 = vsyncadd [#allocation3], 4294966272 }
  0x25   :  { %474 = dma.done.wait [#allocation6], 1024  }
  0x26   :  { %475 = vsyncadd [#allocation6], 4294966272  ;;  %v482_v0 = vmov 0   ;;  %v483_v1 = vmov 0.0   ;;  %v47_v2 = vld [vmem:[%s554_s0] sm:$0xff]  ;;  %v386_v3 = vld [vmem:[#allocation2] sm:$0xff]   ;;  %v48_v11 = vlaneseq }
  0x27   :  { %385 = vset.pattern.permute.xlu0 %v482_v0  ;;  %336 = vmatprep.subr.bf16.mxu0 %v483_v1  ;;  %vm484_vm0 = vmmov 0   ;;  %v387_v4 = vld [vmem:[#allocation2 + $0x8] sm:$0xff]   ;;  %v388_v5 = vld [vmem:[#allocation2 + $0x10] sm:$0xff]   ;;  %v389_v6 = vld [vmem:[#allocation2 + $0x18] sm:$0xff]   ;;  %v485_v14 = vmov 1.0|1.0  }
  0x28   :  { %356 = vmatprep.subr.bf16.mxu1 %v483_v1  ;;  %51 = vperm.xlu0 %385, %v47_v2   ;;  %v390_v7 = vld [vmem:[#allocation2 + $0x20] sm:$0xff]   ;;  %v391_v8 = vld [vmem:[#allocation2 + $0x28] sm:$0xff]   ;;  %v392_v9 = vld [vmem:[#allocation2 + $0x30] sm:$0xff]   ;;  %v49_v12 = vand.u32 127, %v48_v11  ;;  %s486_s16 = smov [#allocation7]  }
  0x29   :  { %352 = vmatprep.mubr.msk.bf16.mxu0 %vm484_vm0, %v483_v1  ;;  %372 = vmatprep.mubr.msk.bf16.mxu1 %vm484_vm0, %v483_v1  ;;  %v393_v10 = vld [vmem:[#allocation2 + $0x38] sm:$0xff]   ;;  %v394_v15 = vld [vmem:[#allocation5] sm:$0xff]   ;;  %v395_v16 = vld [vmem:[#allocation5 + $0x8] sm:$0xff]   ;;  %s287_s17 = sshll.u32 %s486_s16, 4  ;;  %s288_s17 = int_to_ptr.vmem [resolvable:$true] %s287_s17 }
  0x2a   :  { %337 = vmatpush3.bf16.msra.mxu0 %v386_v3  ;;  %357 = vmatpush3.bf16.msra.mxu1 %v394_v15  ;;  %v396_v17 = vld [vmem:[#allocation5 + $0x10] sm:$0xff]   ;;  %v397_v18 = vld [vmem:[#allocation5 + $0x18] sm:$0xff]   ;;  %v398_v19 = vld [vmem:[#allocation5 + $0x20] sm:$0xff]   ;;  %s450_s18 = scalar_lea.vmem %s288_s17, 128  ;;  %p455_p3 = scmp.lt.s32.totalorder %s288_s17, %s288_s17 }
  0x2b   :  { %338 = vmatprep.subr.bf16.mxu0 %v483_v1  ;;  %358 = vmatprep.subr.bf16.mxu1 %v483_v1  ;;  %v399_v20 = vld [vmem:[#allocation5 + $0x28] sm:$0xff]   ;;  %v400_v21 = vld [vmem:[#allocation5 + $0x30] sm:$0xff]   ;;  %v401_v22 = vld [vmem:[#allocation5 + $0x38] sm:$0xff]   ;;  %p451_p2 = scmp.ne.s32.totalorder %s288_s17, %s450_s18  ;;  %p456_p4 = scmp.lt.s32.totalorder %s450_s18, %s450_s18 }
  0x2c   :  { %v309_v33 = vld [vmem:[%s557_s3] ss:$0 sm:$0xff] }
  0x2d   :  { %p457_p5 = por %p456_p4, %p455_p3 }
  0x2e   :  { %339 = vmatpush3.bf16.msra.mxu0 %v387_v4  ;;  %359 = vmatpush3.bf16.msra.mxu1 %v395_v16 }
  0x2f   :  { %340 = vmatprep.subr.bf16.mxu0 %v483_v1  ;;  %360 = vmatprep.subr.bf16.mxu1 %v483_v1  ;;  %p458_p6 = pnand %p457_p5, %p451_p2 }
  0x32   :  { %341 = vmatpush3.bf16.msra.mxu0 %v388_v5  ;;  %361 = vmatpush3.bf16.msra.mxu1 %v396_v17 }
  0x33   :  { %342 = vmatprep.subr.bf16.mxu0 %v483_v1  ;;  %362 = vmatprep.subr.bf16.mxu1 %v483_v1 }
  0x36   :  { %343 = vmatpush3.bf16.msra.mxu0 %v389_v6  ;;  %363 = vmatpush3.bf16.msra.mxu1 %v397_v18 }
  0x37   :  { %344 = vmatprep.subr.bf16.mxu0 %v483_v1  ;;  %364 = vmatprep.subr.bf16.mxu1 %v483_v1 }
  0x3a   :  { %345 = vmatpush3.bf16.msra.mxu0 %v390_v7  ;;  %365 = vmatpush3.bf16.msra.mxu1 %v398_v19 }
  0x3b   :  { %346 = vmatprep.subr.bf16.mxu0 %v483_v1  ;;  %366 = vmatprep.subr.bf16.mxu1 %v483_v1 }
  0x3e   :  { %347 = vmatpush3.bf16.msra.mxu0 %v391_v8  ;;  %367 = vmatpush3.bf16.msra.mxu1 %v399_v20 }
  0x3f   :  { %348 = vmatprep.subr.bf16.mxu0 %v483_v1  ;;  %368 = vmatprep.subr.bf16.mxu1 %v483_v1 }
  0x42   :  { %349 = vmatpush3.bf16.msra.mxu0 %v392_v9  ;;  %369 = vmatpush3.bf16.msra.mxu1 %v400_v21 }
  0x43   :  { %350 = vmatprep.subr.bf16.mxu0 %v483_v1  ;;  %370 = vmatprep.subr.bf16.mxu1 %v483_v1 }
  0x46   :  { %351 = vmatpush3.bf16.msra.mxu0 %v393_v10  ;;  %371 = vmatpush3.bf16.msra.mxu1 %v401_v22 }
  0xa7   :  { %v52_v13 = vpop.permute.xlu0 %51 }
  0xa8   :  { %vm53_vm1 = vcmp.eq.s32.totalorder %v49_v12, %v52_v13 }
  0xa9   :  { %vm306_vm2 = vmpackc.low %vm53_vm1, %vm53_vm1 }
  0xaa   :  { %353 = vmatmul.mubr.msk.bf16.vlgmr.msra.gmra.mrb[0].mxu0 %vm306_vm2, %v485_v14 }
 0x17d   :  { %v155_v23 = vpop.f32.mrb[0].mxu0 }
 0x17e   :  { %v308_v24 = vmul.f32 -1.442695, %v155_v23  ;;  %v354_v25 = vpop.f32.mrb[1].mxu0 }
 0x17f   :  { %v158_v26 = vpop.f32.mrb[2].mxu0 }
 0x180   :  { %402 = vpow2.f32 %v308_v24  ;;  %v355_v27 = vpop.f32.mrb[3].mxu0 }
 0x18a   :  { %v403_v28 = vpop.eup %402 }
 0x18b   :  { %v164_v29 = vadd.f32 1.0, %v403_v28 }
 0x18d   :  { %404 = vrcp.f32 %v164_v29 }
 0x197   :  { %v405_v30 = vpop.eup %404 }
 0x198   :  { %v167_v31 = vmul.f32 %v405_v30, %v155_v23 }
 0x19a   :  { %v168_v32 = vpack.c.bf16 %v167_v31, %v167_v31 }
 0x19c   :  { %373 = vmatmul.mubr.bf16.vlgmr.msra.gmra.mrb[0].mxu1 %v168_v32 }
 0x26f   :  { %v274_v34 = vpop.f32.mrb[0].mxu1 }
 0x270   :  { %v275_v35 = vadd.f32 %v309_v33, %v274_v34  ;;  %v374_v36 = vpop.f32.mrb[1].mxu1 }
 0x271   :  { %v277_v37 = vpop.f32.mrb[2].mxu1 }
 0x272   :  { %280 = vst [vmem:[#allocation7] sm:$0xff] %v275_v35  ;;  %v375_v38 = vpop.f32.mrb[3].mxu1 }
 0x273   :  { %461 = shalt.err (!%p458_p6)
}
 0x274   :  { %s462_s3 = scalar_lea.hbm %s558_s4, 128 }
 0x275   :  { %p463_p7 = scmp.ne.s32.totalorder %s558_s4, %s462_s3  ;;  %p466_p8 = scmp.lt.u32.totalorder %s462_s3, %s558_s4 }
 0x277   :  { %p468_p9 = pnand %p466_p8, %p463_p7 }
 0x279   :  { %471 = shalt.err (!%p468_p9)
}
 0x27a   :  { %290 = dma.vmem_to_hbm [thread:$0]  %s288_s17, 128, %s558_s4, [#allocation4]  }
 0x27b   :  { %476 = dma.done.wait [#allocation4], 128  }
 0x27c   :  { %477 = vsyncadd [#allocation4], 4294967168 }
 0x27d   :  { %294 = vsyncpa [#allocation3], 1 }
 0x27e   :  { %295 = vsyncpa [#allocation6], 1 }
 0x27f   :  { %296 = vsyncpa [#allocation4], 1 }

</bundles_post_ra>
